<compile_context>
chip_gen: v5e
topology: v5e:2x2
jax: 0.10.0
libtpu: 0.0.40
codegen_flags: <defaults>
</compile_context>

<pallas_src>
import functools

import jax
import jax.numpy as jnp
from jax.experimental import pallas as pl
from jax.experimental.pallas import tpu as pltpu


# -----------------------------------------------------------------------------
# Fused kernel: one batch element per grid step, everything stays in VMEM.
# -----------------------------------------------------------------------------
def _transformer_block_kernel(
    x_ref,          # (1, S, D)   f32 activations
    wqkv_ref,       # (3H, D, dh) bf16  per-head fused QKV weights (Wq pre-scaled)
    bqkv_ref,       # (3H, 1, dh) f32   per-head fused QKV biases  (bq pre-scaled)
    wo_ref,         # (H, dh, D)  bf16  per-head output projection
    bo_ref,         # (1, D)      f32
    ln1_g_ref, ln1_b_ref,   # (1, D) f32
    w1_ref,         # (D, F)      bf16
    b1_ref,         # (1, F)      f32
    w2_ref,         # (F, D)      bf16
    b2_ref,         # (1, D)      f32
    ln2_g_ref, ln2_b_ref,   # (1, D) f32
    o_ref,          # (1, S, D)   f32
    *, n_heads, eps=1e-5,
):
    f32 = jnp.float32
    bf16 = jnp.bfloat16

    x = x_ref[0]                                    # (S, D) f32
    S, D = x.shape
    G = 3 * n_heads

    # ---- fused QKV projection (head-batched, bf16 MXU, f32 accumulation) ----
    xb = jnp.broadcast_to(x.astype(bf16), (G, S, D))
    qkv = jnp.einsum("gsd,gdk->gsk", xb, wqkv_ref[...],
                     preferred_element_type=f32) + bqkv_ref[...]   # (3H, S, dh)
    q = qkv[:n_heads]                               # (H, S, dh); scale pre-folded
    k = qkv[n_heads:2 * n_heads]
    v = qkv[2 * n_heads:]

    # ---- attention: softmax(Q K^T) V, batched over heads (no transposes) ----
    s = jnp.einsum("hqd,hkd->hqk", q.astype(bf16), k.astype(bf16),
                   preferred_element_type=f32)      # (H, S, S)
    s = s - jnp.max(s, axis=-1, keepdims=True)      # stable softmax, f32 path
    p = jnp.exp(s)
    denom = jnp.sum(p, axis=-1, keepdims=True)      # (H, S, 1)
    ctx = jnp.einsum("hqk,hkd->hqd", p.astype(bf16), v.astype(bf16),
                     preferred_element_type=f32)    # (H, S, dh) unnormalized
    ctx = ctx * pl.reciprocal(denom, approx=True)   # EUP reciprocal, cheap

    # ---- output projection:  sum_h  ctx_h @ Wo_h  (+ bias) ----
    proj = jnp.einsum("hsd,hdk->hsk", ctx.astype(bf16), wo_ref[...],
                      preferred_element_type=f32)   # (H, S, D)
    attn_out = jnp.sum(proj, axis=0) + bo_ref[...]  # (S, D)

    # ---- residual + LayerNorm 1 (f32 elementwise) ----
    z = x + attn_out
    mu = jnp.mean(z, axis=-1, keepdims=True)
    var = jnp.mean(jnp.square(z - mu), axis=-1, keepdims=True)
    h1 = (z - mu) * jax.lax.rsqrt(var + eps) * ln1_g_ref[...] + ln1_b_ref[...]

    # ---- feed-forward (bf16 MXU, f32 accumulation) ----
    hid = jnp.dot(h1.astype(bf16), w1_ref[...],
                  preferred_element_type=f32) + b1_ref[...]         # (S, F)
    hid = jnp.maximum(hid, 0.0)
    ff = jnp.dot(hid.astype(bf16), w2_ref[...],
                 preferred_element_type=f32) + b2_ref[...]          # (S, D)

    # ---- residual + LayerNorm 2 ----
    z2 = h1 + ff
    mu2 = jnp.mean(z2, axis=-1, keepdims=True)
    var2 = jnp.mean(jnp.square(z2 - mu2), axis=-1, keepdims=True)
    out = (z2 - mu2) * jax.lax.rsqrt(var2 + eps) * ln2_g_ref[...] + ln2_b_ref[...]

    o_ref[0] = out.astype(o_ref.dtype)


# -----------------------------------------------------------------------------
# Wrapper
# -----------------------------------------------------------------------------
def transformer_block(x, prepared, n_heads):
    B, S, D = x.shape
    H = n_heads
    dh = D // H
    F = prepared["w1"].shape[1]

    def full(shape):
        nd = len(shape)
        return pl.BlockSpec(shape, lambda b: (0,) * nd)

    act_spec = pl.BlockSpec((1, S, D), lambda b: (b, 0, 0))
    kernel = functools.partial(_transformer_block_kernel, n_heads=n_heads)

    # NOTE: weight blocks have constant index maps; at real sizes consider
    # pipeline_mode buffering reduction so they are not double-buffered in VMEM.
    return pl.pallas_call(
        kernel,
        out_shape=jax.ShapeDtypeStruct((B, S, D), jnp.float32),
        grid=(B,),
        in_specs=[
            act_spec,
            full((3 * H, D, dh)), full((3 * H, 1, dh)),
            full((H, dh, D)), full((1, D)),
            full((1, D)), full((1, D)),
            full((D, F)), full((1, F)),
            full((F, D)), full((1, D)),
            full((1, D)), full((1, D)),
        ],
        out_specs=act_spec,
        compiler_params=pltpu.CompilerParams(
            dimension_semantics=("parallel",),
        ),
    )(x,
      prepared["wqkv"], prepared["bqkv"], prepared["wo"], prepared["bo"],
      prepared["norm1_g"], prepared["norm1_b"],
      prepared["w1"], prepared["b1"], prepared["w2"], prepared["b2"],
      prepared["norm2_g"], prepared["norm2_b"])


# -----------------------------------------------------------------------------
# Parameter init (PyTorch-like layout) + host-side packing for the kernel
# -----------------------------------------------------------------------------
def init_params(key, d_model, d_ff):
    ks = jax.random.split(key, 8)

    def lin(k, fan_in, fan_out):
        w = jax.random.normal(k, (fan_in, fan_out), jnp.float32) * (1.0 / fan_in ** 0.5)
        b = jnp.zeros((1, fan_out), jnp.float32)
        return w, b

    wq, bq = lin(ks[0], d_model, d_model)
    wk, bk = lin(ks[1], d_model, d_model)
    wv, bv = lin(ks[2], d_model, d_model)
    wo, bo = lin(ks[3], d_model, d_model)
    w1, b1 = lin(ks[4], d_model, d_ff)
    w2, b2 = lin(ks[5], d_ff, d_model)
    return {
        "attn": {"wq": wq, "bq": bq, "wk": wk, "bk": bk,
                 "wv": wv, "bv": bv, "wo": wo, "bo": bo},
        "ff": {"w1": w1, "b1": b1, "w2": w2, "b2": b2},
        "norm1_g": jnp.ones((1, d_model), jnp.float32),
        "norm1_b": jnp.zeros((1, d_model), jnp.float32),
        "norm2_g": jnp.ones((1, d_model), jnp.float32),
        "norm2_b": jnp.zeros((1, d_model), jnp.float32),
    }


def prepare_params(params, n_heads):
    """One-time host-side repack: per-head QKV/O layout, scale fold, bf16 weights."""
    a = params["attn"]
    D = a["wq"].shape[0]
    dh = D // n_heads
    scale = 1.0 / (dh ** 0.5)

    def per_head(w):                       # (D, H*dh) -> (H, D, dh)
        return jnp.transpose(w.reshape(D, n_heads, dh), (1, 0, 2))

    wqkv = jnp.concatenate(
        [per_head(a["wq"]) * scale, per_head(a["wk"]), per_head(a["wv"])], axis=0)
    bqkv = jnp.concatenate(
        [a["bq"].reshape(n_heads, 1, dh) * scale,
         a["bk"].reshape(n_heads, 1, dh),
         a["bv"].reshape(n_heads, 1, dh)], axis=0)
    wo_h = a["wo"].reshape(n_heads, dh, D)

    return {
        "wqkv": wqkv.astype(jnp.bfloat16),
        "bqkv": bqkv.astype(jnp.float32),
        "wo": wo_h.astype(jnp.bfloat16),
        "bo": a["bo"],
        "w1": params["ff"]["w1"].astype(jnp.bfloat16),
        "b1": params["ff"]["b1"],
        "w2": params["ff"]["w2"].astype(jnp.bfloat16),
        "b2": params["ff"]["b2"],
        "norm1_g": params["norm1_g"], "norm1_b": params["norm1_b"],
        "norm2_g": params["norm2_g"], "norm2_b": params["norm2_b"],
    }


# -----------------------------------------------------------------------------
# Pure-JAX f32 reference (same math as the PyTorch module, dropout = identity)
# -----------------------------------------------------------------------------
def reference(x, params, n_heads):
    a = params["attn"]
    B, S, D = x.shape
    dh = D // n_heads

    q = x @ a["wq"] + a["bq"]
    k = x @ a["wk"] + a["bk"]
    v = x @ a["wv"] + a["bv"]

    def heads(t):
        return jnp.transpose(t.reshape(B, S, n_heads, dh), (0, 2, 1, 3))

    qh, kh, vh = heads(q), heads(k), heads(v)
    s = jnp.einsum("bhqd,bhkd->bhqk", qh, kh) / (dh ** 0.5)
    p = jax.nn.softmax(s, axis=-1)
    ctx = jnp.einsum("bhqk,bhkd->bhqd", p, vh)
    ctx = jnp.transpose(ctx, (0, 2, 1, 3)).reshape(B, S, D)
    attn_out = ctx @ a["wo"] + a["bo"]

    def ln(z, g, b, eps=1e-5):
        mu = z.mean(-1, keepdims=True)
        var = ((z - mu) ** 2).mean(-1, keepdims=True)
        return (z - mu) * jax.lax.rsqrt(var + eps) * g + b

    h1 = ln(x + attn_out, params["norm1_g"], params["norm1_b"])
    hid = jnp.maximum(h1 @ params["ff"]["w1"] + params["ff"]["b1"], 0.0)
    ff = hid @ params["ff"]["w2"] + params["ff"]["b2"]
    return ln(h1 + ff, params["norm2_g"], params["norm2_b"])


# -----------------------------------------------------------------------------
# Main
# -----------------------------------------------------------------------------
if __name__ == "__main__":
    # batch, seq, d_model, n_heads, d_ff  (lane-dense: D and F multiples of 128)
    B, S, D, H, F = 2, 8, 128, 4, 256

    key = jax.random.PRNGKey(0)
    k_x, k_p = jax.random.split(key)
    x = jax.random.normal(k_x, (B, S, D), jnp.float32)

    params = init_params(k_p, D, F)
    prepared = prepare_params(params, H)

    out = transformer_block(x, prepared, n_heads=H)
    out = jax.block_until_ready(out)
    assert out.shape == (B, S, D)
    assert jnp.all(jnp.isfinite(out))

    # bf16-MXU / f32-accumulate kernel vs. full-f32 reference: loose tolerance.
    ref = reference(x, params, H)
    err = float(jnp.max(jnp.abs(out - ref)))
    assert err < 0.25, f"max |err| = {err}"

    print("KERNEL_OK")
</pallas_src>

<mosaic_0001>
module attributes {stable_mosaic.version = 11 : i64} {
  func.func @_transformer_block_kernel(%arg0: i32, %arg1: memref<1x8x128xf32, #tpu.memory_space<vmem>>, %arg2: memref<12x128x32xbf16, #tpu.memory_space<vmem>>, %arg3: memref<12x1x32xf32, #tpu.memory_space<vmem>>, %arg4: memref<4x32x128xbf16, #tpu.memory_space<vmem>>, %arg5: memref<1x128xf32, #tpu.memory_space<vmem>>, %arg6: memref<1x128xf32, #tpu.memory_space<vmem>>, %arg7: memref<1x128xf32, #tpu.memory_space<vmem>>, %arg8: memref<128x256xbf16, #tpu.memory_space<vmem>>, %arg9: memref<1x256xf32, #tpu.memory_space<vmem>>, %arg10: memref<256x128xbf16, #tpu.memory_space<vmem>>, %arg11: memref<1x128xf32, #tpu.memory_space<vmem>>, %arg12: memref<1x128xf32, #tpu.memory_space<vmem>>, %arg13: memref<1x128xf32, #tpu.memory_space<vmem>>, %arg14: memref<1x8x128xf32, #tpu.memory_space<vmem>>) attributes {dimension_semantics = [#tpu.dimension_semantics<parallel>], iteration_bounds = array<i64: 2>, scalar_prefetch = 0 : i64, scratch_operands = 0 : i64, tpu.core_type = #tpu.core_type<tc>, window_params = [{transform_indices = @transform_0, window_bounds = array<i64: 1, 8, 128>}, {pipeline_mode = #tpu.pipeline_mode<synchronous>, transform_indices = @transform_1, window_bounds = array<i64: 12, 128, 32>}, {pipeline_mode = #tpu.pipeline_mode<synchronous>, transform_indices = @transform_2, window_bounds = array<i64: 12, 1, 32>}, {pipeline_mode = #tpu.pipeline_mode<synchronous>, transform_indices = @transform_3, window_bounds = array<i64: 4, 32, 128>}, {pipeline_mode = #tpu.pipeline_mode<synchronous>, transform_indices = @transform_4, window_bounds = array<i64: 1, 128>}, {pipeline_mode = #tpu.pipeline_mode<synchronous>, transform_indices = @transform_5, window_bounds = array<i64: 1, 128>}, {pipeline_mode = #tpu.pipeline_mode<synchronous>, transform_indices = @transform_6, window_bounds = array<i64: 1, 128>}, {pipeline_mode = #tpu.pipeline_mode<synchronous>, transform_indices = @transform_7, window_bounds = array<i64: 128, 256>}, {pipeline_mode = #tpu.pipeline_mode<synchronous>, transform_indices = @transform_8, window_bounds = array<i64: 1, 256>}, {pipeline_mode = #tpu.pipeline_mode<synchronous>, transform_indices = @transform_9, window_bounds = array<i64: 256, 128>}, {pipeline_mode = #tpu.pipeline_mode<synchronous>, transform_indices = @transform_10, window_bounds = array<i64: 1, 128>}, {pipeline_mode = #tpu.pipeline_mode<synchronous>, transform_indices = @transform_11, window_bounds = array<i64: 1, 128>}, {pipeline_mode = #tpu.pipeline_mode<synchronous>, transform_indices = @transform_12, window_bounds = array<i64: 1, 128>}, {transform_indices = @transform_13, window_bounds = array<i64: 1, 8, 128>}]} {
    %c0 = arith.constant 0 : index
    %c0_0 = arith.constant 0 : index
    %c0_1 = arith.constant 0 : index
    %0 = vector.load %arg1[%c0, %c0_0, %c0_1] : memref<1x8x128xf32, #tpu.memory_space<vmem>>, vector<1x8x128xf32>
    %1 = vector.shape_cast %0 : vector<1x8x128xf32> to vector<8x128xf32>
    %2 = arith.truncf %1 : vector<8x128xf32> to vector<8x128xbf16>
    %3 = vector.shape_cast %2 : vector<8x128xbf16> to vector<1x8x128xbf16>
    %4 = vector.broadcast %3 : vector<1x8x128xbf16> to vector<12x8x128xbf16>
    %c0_2 = arith.constant 0 : index
    %c0_3 = arith.constant 0 : index
    %c0_4 = arith.constant 0 : index
    %5 = vector.load %arg2[%c0_2, %c0_3, %c0_4] : memref<12x128x32xbf16, #tpu.memory_space<vmem>>, vector<12x128x32xbf16>
    "tpu.trace_start"() <{level = 10 : i32, message = "gsd,gdk->gsk"}> : () -> ()
    %cst = arith.constant dense<0.000000e+00> : vector<12x8x32xf32>
    %6 = tpu.matmul %4, %5, %cst {dimension_numbers = #tpu.dot_dimension_numbers<[2], [1], [1], [2], [0, 0, 0, 1, 1, 2], [0], [0]>} : vector<12x8x128xbf16>, vector<12x128x32xbf16>, vector<12x8x32xf32> -> vector<12x8x32xf32>
    "tpu.trace_stop"() : () -> ()
    %c0_5 = arith.constant 0 : index
    %c0_6 = arith.constant 0 : index
    %c0_7 = arith.constant 0 : index
    %7 = vector.load %arg3[%c0_5, %c0_6, %c0_7] : memref<12x1x32xf32, #tpu.memory_space<vmem>>, vector<12x1x32xf32>
    %8 = vector.broadcast %7 : vector<12x1x32xf32> to vector<12x8x32xf32>
    %9 = arith.addf %6, %8 : vector<12x8x32xf32>
    %10 = vector.extract_strided_slice %9 {offsets = [0, 0, 0], sizes = [4, 8, 32], strides = [1, 1, 1]} : vector<12x8x32xf32> to vector<4x8x32xf32>
    %11 = vector.extract_strided_slice %9 {offsets = [4, 0, 0], sizes = [4, 8, 32], strides = [1, 1, 1]} : vector<12x8x32xf32> to vector<4x8x32xf32>
    %12 = vector.extract_strided_slice %9 {offsets = [8, 0, 0], sizes = [4, 8, 32], strides = [1, 1, 1]} : vector<12x8x32xf32> to vector<4x8x32xf32>
    %13 = arith.truncf %10 : vector<4x8x32xf32> to vector<4x8x32xbf16>
    %14 = arith.truncf %11 : vector<4x8x32xf32> to vector<4x8x32xbf16>
    "tpu.trace_start"() <{level = 10 : i32, message = "hqd,hkd->hqk"}> : () -> ()
    %cst_8 = arith.constant dense<0.000000e+00> : vector<4x8x8xf32>
    %15 = tpu.matmul %13, %14, %cst_8 {dimension_numbers = #tpu.dot_dimension_numbers<[2], [2], [1], [1], [0, 0, 0, 1, 1, 1], [0], [0]>} : vector<4x8x32xbf16>, vector<4x8x32xbf16>, vector<4x8x8xf32> -> vector<4x8x8xf32>
    "tpu.trace_stop"() : () -> ()
    %cst_9 = arith.constant dense<0xFF800000> : vector<4x8xf32>
    %16 = vector.multi_reduction <maximumf>, %15, %cst_9 [2] : vector<4x8x8xf32> to vector<4x8xf32>
    %17 = vector.shape_cast %16 : vector<4x8xf32> to vector<4x8x1xf32>
    %18 = vector.broadcast %17 : vector<4x8x1xf32> to vector<4x8x8xf32>
    %19 = arith.subf %15, %18 : vector<4x8x8xf32>
    %20 = math.exp %19 : vector<4x8x8xf32>
    %cst_10 = arith.constant dense<0.000000e+00> : vector<4x8xf32>
    %21 = vector.multi_reduction <add>, %20, %cst_10 [2] : vector<4x8x8xf32> to vector<4x8xf32>
    %22 = vector.shape_cast %21 : vector<4x8xf32> to vector<4x8x1xf32>
    %23 = arith.truncf %20 : vector<4x8x8xf32> to vector<4x8x8xbf16>
    %24 = arith.truncf %12 : vector<4x8x32xf32> to vector<4x8x32xbf16>
    "tpu.trace_start"() <{level = 10 : i32, message = "hqk,hkd->hqd"}> : () -> ()
    %cst_11 = arith.constant dense<0.000000e+00> : vector<4x8x32xf32>
    %25 = tpu.matmul %23, %24, %cst_11 {dimension_numbers = #tpu.dot_dimension_numbers<[2], [1], [1], [2], [0, 0, 0, 1, 1, 2], [0], [0]>} : vector<4x8x8xbf16>, vector<4x8x32xbf16>, vector<4x8x32xf32> -> vector<4x8x32xf32>
    "tpu.trace_stop"() : () -> ()
    %26 = tpu.reciprocal %22 {approx = true} : vector<4x8x1xf32> -> vector<4x8x1xf32>
    %27 = vector.broadcast %26 : vector<4x8x1xf32> to vector<4x8x32xf32>
    %28 = arith.mulf %25, %27 : vector<4x8x32xf32>
    %29 = arith.truncf %28 : vector<4x8x32xf32> to vector<4x8x32xbf16>
    %c0_12 = arith.constant 0 : index
    %c0_13 = arith.constant 0 : index
    %c0_14 = arith.constant 0 : index
    %30 = vector.load %arg4[%c0_12, %c0_13, %c0_14] : memref<4x32x128xbf16, #tpu.memory_space<vmem>>, vector<4x32x128xbf16>
    "tpu.trace_start"() <{level = 10 : i32, message = "hsd,hdk->hsk"}> : () -> ()
    %cst_15 = arith.constant dense<0.000000e+00> : vector<4x8x128xf32>
    %31 = tpu.matmul %29, %30, %cst_15 {dimension_numbers = #tpu.dot_dimension_numbers<[2], [1], [1], [2], [0, 0, 0, 1, 1, 2], [0], [0]>} : vector<4x8x32xbf16>, vector<4x32x128xbf16>, vector<4x8x128xf32> -> vector<4x8x128xf32>
    "tpu.trace_stop"() : () -> ()
    %cst_16 = arith.constant dense<0.000000e+00> : vector<8x128xf32>
    %32 = vector.multi_reduction <add>, %31, %cst_16 [0] : vector<4x8x128xf32> to vector<8x128xf32>
    %c0_17 = arith.constant 0 : index
    %c0_18 = arith.constant 0 : index
    %33 = vector.load %arg5[%c0_17, %c0_18] : memref<1x128xf32, #tpu.memory_space<vmem>>, vector<1x128xf32>
    %34 = vector.broadcast %33 : vector<1x128xf32> to vector<8x128xf32>
    %35 = arith.addf %32, %34 : vector<8x128xf32>
    %36 = arith.addf %1, %35 : vector<8x128xf32>
    %cst_19 = arith.constant dense<0.000000e+00> : vector<8xf32>
    %37 = vector.multi_reduction <add>, %36, %cst_19 [1] : vector<8x128xf32> to vector<8xf32>
    %38 = vector.shape_cast %37 : vector<8xf32> to vector<8x1xf32>
    %cst_20 = arith.constant 1.280000e+02 : f32
    %39 = vector.broadcast %cst_20 : f32 to vector<8x1xf32>
    %40 = arith.divf %38, %39 : vector<8x1xf32>
    %41 = vector.broadcast %40 : vector<8x1xf32> to vector<8x128xf32>
    %42 = arith.subf %36, %41 : vector<8x128xf32>
    %43 = arith.mulf %42, %42 : vector<8x128xf32>
    %cst_21 = arith.constant dense<0.000000e+00> : vector<8xf32>
    %44 = vector.multi_reduction <add>, %43, %cst_21 [1] : vector<8x128xf32> to vector<8xf32>
    %45 = vector.shape_cast %44 : vector<8xf32> to vector<8x1xf32>
    %cst_22 = arith.constant 1.280000e+02 : f32
    %46 = vector.broadcast %cst_22 : f32 to vector<8x1xf32>
    %47 = arith.divf %45, %46 : vector<8x1xf32>
    %48 = vector.broadcast %40 : vector<8x1xf32> to vector<8x128xf32>
    %49 = arith.subf %36, %48 : vector<8x128xf32>
    %cst_23 = arith.constant 9.99999974E-6 : f32
    %50 = vector.broadcast %cst_23 : f32 to vector<8x1xf32>
    %51 = arith.addf %47, %50 : vector<8x1xf32>
    %52 = math.rsqrt %51 : vector<8x1xf32>
    %53 = vector.broadcast %52 : vector<8x1xf32> to vector<8x128xf32>
    %54 = arith.mulf %49, %53 : vector<8x128xf32>
    %c0_24 = arith.constant 0 : index
    %c0_25 = arith.constant 0 : index
    %55 = vector.load %arg6[%c0_24, %c0_25] : memref<1x128xf32, #tpu.memory_space<vmem>>, vector<1x128xf32>
    %56 = vector.broadcast %55 : vector<1x128xf32> to vector<8x128xf32>
    %57 = arith.mulf %54, %56 : vector<8x128xf32>
    %c0_26 = arith.constant 0 : index
    %c0_27 = arith.constant 0 : index
    %58 = vector.load %arg7[%c0_26, %c0_27] : memref<1x128xf32, #tpu.memory_space<vmem>>, vector<1x128xf32>
    %59 = vector.broadcast %58 : vector<1x128xf32> to vector<8x128xf32>
    %60 = arith.addf %57, %59 : vector<8x128xf32>
    %61 = arith.truncf %60 : vector<8x128xf32> to vector<8x128xbf16>
    %c0_28 = arith.constant 0 : index
    %c0_29 = arith.constant 0 : index
    %62 = vector.load %arg8[%c0_28, %c0_29] : memref<128x256xbf16, #tpu.memory_space<vmem>>, vector<128x256xbf16>
    %cst_30 = arith.constant dense<0.000000e+00> : vector<8x256xf32>
    %63 = tpu.matmul %61, %62, %cst_30 {dimension_numbers = #tpu.dot_dimension_numbers<[1], [0], [0], [1], [0, 0, 1, 1], [], []>} : vector<8x128xbf16>, vector<128x256xbf16>, vector<8x256xf32> -> vector<8x256xf32>
    %c0_31 = arith.constant 0 : index
    %c0_32 = arith.constant 0 : index
    %64 = vector.load %arg9[%c0_31, %c0_32] : memref<1x256xf32, #tpu.memory_space<vmem>>, vector<1x256xf32>
    %65 = vector.broadcast %64 : vector<1x256xf32> to vector<8x256xf32>
    %66 = arith.addf %63, %65 : vector<8x256xf32>
    %cst_33 = arith.constant 0.000000e+00 : f32
    %67 = vector.broadcast %cst_33 : f32 to vector<8x256xf32>
    %68 = arith.maximumf %66, %67 : vector<8x256xf32>
    %69 = arith.truncf %68 : vector<8x256xf32> to vector<8x256xbf16>
    %c0_34 = arith.constant 0 : index
    %c0_35 = arith.constant 0 : index
    %70 = vector.load %arg10[%c0_34, %c0_35] : memref<256x128xbf16, #tpu.memory_space<vmem>>, vector<256x128xbf16>
    %cst_36 = arith.constant dense<0.000000e+00> : vector<8x128xf32>
    %71 = tpu.matmul %69, %70, %cst_36 {dimension_numbers = #tpu.dot_dimension_numbers<[1], [0], [0], [1], [0, 0, 1, 1], [], []>} : vector<8x256xbf16>, vector<256x128xbf16>, vector<8x128xf32> -> vector<8x128xf32>
    %c0_37 = arith.constant 0 : index
    %c0_38 = arith.constant 0 : index
    %72 = vector.load %arg11[%c0_37, %c0_38] : memref<1x128xf32, #tpu.memory_space<vmem>>, vector<1x128xf32>
    %73 = vector.broadcast %72 : vector<1x128xf32> to vector<8x128xf32>
    %74 = arith.addf %71, %73 : vector<8x128xf32>
    %75 = arith.addf %60, %74 : vector<8x128xf32>
    %cst_39 = arith.constant dense<0.000000e+00> : vector<8xf32>
    %76 = vector.multi_reduction <add>, %75, %cst_39 [1] : vector<8x128xf32> to vector<8xf32>
    %77 = vector.shape_cast %76 : vector<8xf32> to vector<8x1xf32>
    %cst_40 = arith.constant 1.280000e+02 : f32
    %78 = vector.broadcast %cst_40 : f32 to vector<8x1xf32>
    %79 = arith.divf %77, %78 : vector<8x1xf32>
    %80 = vector.broadcast %79 : vector<8x1xf32> to vector<8x128xf32>
    %81 = arith.subf %75, %80 : vector<8x128xf32>
    %82 = arith.mulf %81, %81 : vector<8x128xf32>
    %cst_41 = arith.constant dense<0.000000e+00> : vector<8xf32>
    %83 = vector.multi_reduction <add>, %82, %cst_41 [1] : vector<8x128xf32> to vector<8xf32>
    %84 = vector.shape_cast %83 : vector<8xf32> to vector<8x1xf32>
    %cst_42 = arith.constant 1.280000e+02 : f32
    %85 = vector.broadcast %cst_42 : f32 to vector<8x1xf32>
    %86 = arith.divf %84, %85 : vector<8x1xf32>
    %87 = vector.broadcast %79 : vector<8x1xf32> to vector<8x128xf32>
    %88 = arith.subf %75, %87 : vector<8x128xf32>
    %cst_43 = arith.constant 9.99999974E-6 : f32
    %89 = vector.broadcast %cst_43 : f32 to vector<8x1xf32>
    %90 = arith.addf %86, %89 : vector<8x1xf32>
    %91 = math.rsqrt %90 : vector<8x1xf32>
    %92 = vector.broadcast %91 : vector<8x1xf32> to vector<8x128xf32>
    %93 = arith.mulf %88, %92 : vector<8x128xf32>
    %c0_44 = arith.constant 0 : index
    %c0_45 = arith.constant 0 : index
    %94 = vector.load %arg12[%c0_44, %c0_45] : memref<1x128xf32, #tpu.memory_space<vmem>>, vector<1x128xf32>
    %95 = vector.broadcast %94 : vector<1x128xf32> to vector<8x128xf32>
    %96 = arith.mulf %93, %95 : vector<8x128xf32>
    %c0_46 = arith.constant 0 : index
    %c0_47 = arith.constant 0 : index
    %97 = vector.load %arg13[%c0_46, %c0_47] : memref<1x128xf32, #tpu.memory_space<vmem>>, vector<1x128xf32>
    %98 = vector.broadcast %97 : vector<1x128xf32> to vector<8x128xf32>
    %99 = arith.addf %96, %98 : vector<8x128xf32>
    %c0_48 = arith.constant 0 : index
    %c0_49 = arith.constant 0 : index
    %c0_50 = arith.constant 0 : index
    %100 = vector.load %arg14[%c0_48, %c0_49, %c0_50] : memref<1x8x128xf32, #tpu.memory_space<vmem>>, vector<1x8x128xf32>
    %101 = vector.shape_cast %100 : vector<1x8x128xf32> to vector<8x128xf32>
    %102 = vector.shape_cast %99 : vector<8x128xf32> to vector<1x8x128xf32>
    tpu.vector_store %arg14[%c0_48, %c0_49, %c0_50], %102 {strides = array<i32>} : memref<1x8x128xf32, #tpu.memory_space<vmem>>, vector<1x8x128xf32>,
    return
  }
  func.func @transform_0(%arg0: i32) -> (i32, i32, i32) {
    %c0_i32 = arith.constant 0 : i32
    %c0_i32_0 = arith.constant 0 : i32
    %c0_i32_1 = arith.constant 0 : i32
    return %arg0, %c0_i32, %c0_i32_0 : i32, i32, i32
  }
  func.func @transform_1(%arg0: i32) -> (i32, i32, i32) {
    %c0_i32 = arith.constant 0 : i32
    %c0_i32_0 = arith.constant 0 : i32
    %c0_i32_1 = arith.constant 0 : i32
    %c0_i32_2 = arith.constant 0 : i32
    return %c0_i32, %c0_i32_0, %c0_i32_1 : i32, i32, i32
  }
  func.func @transform_2(%arg0: i32) -> (i32, i32, i32) {
    %c0_i32 = arith.constant 0 : i32
    %c0_i32_0 = arith.constant 0 : i32
    %c0_i32_1 = arith.constant 0 : i32
    %c0_i32_2 = arith.constant 0 : i32
    return %c0_i32, %c0_i32_0, %c0_i32_1 : i32, i32, i32
  }
  func.func @transform_3(%arg0: i32) -> (i32, i32, i32) {
    %c0_i32 = arith.constant 0 : i32
    %c0_i32_0 = arith.constant 0 : i32
    %c0_i32_1 = arith.constant 0 : i32
    %c0_i32_2 = arith.constant 0 : i32
    return %c0_i32, %c0_i32_0, %c0_i32_1 : i32, i32, i32
  }
  func.func @transform_4(%arg0: i32) -> (i32, i32) {
    %c0_i32 = arith.constant 0 : i32
    %c0_i32_0 = arith.constant 0 : i32
    %c0_i32_1 = arith.constant 0 : i32
    return %c0_i32, %c0_i32_0 : i32, i32
  }
  func.func @transform_5(%arg0: i32) -> (i32, i32) {
    %c0_i32 = arith.constant 0 : i32
    %c0_i32_0 = arith.constant 0 : i32
    %c0_i32_1 = arith.constant 0 : i32
    return %c0_i32, %c0_i32_0 : i32, i32
  }
  func.func @transform_6(%arg0: i32) -> (i32, i32) {
    %c0_i32 = arith.constant 0 : i32
    %c0_i32_0 = arith.constant 0 : i32
    %c0_i32_1 = arith.constant 0 : i32
    return %c0_i32, %c0_i32_0 : i32, i32
  }
  func.func @transform_7(%arg0: i32) -> (i32, i32) {
    %c0_i32 = arith.constant 0 : i32
    %c0_i32_0 = arith.constant 0 : i32
    %c0_i32_1 = arith.constant 0 : i32
    return %c0_i32, %c0_i32_0 : i32, i32
  }
  func.func @transform_8(%arg0: i32) -> (i32, i32) {
    %c0_i32 = arith.constant 0 : i32
    %c0_i32_0 = arith.constant 0 : i32
    %c0_i32_1 = arith.constant 0 : i32
    return %c0_i32, %c0_i32_0 : i32, i32
  }
  func.func @transform_9(%arg0: i32) -> (i32, i32) {
    %c0_i32 = arith.constant 0 : i32
    %c0_i32_0 = arith.constant 0 : i32
    %c0_i32_1 = arith.constant 0 : i32
    return %c0_i32, %c0_i32_0 : i32, i32
  }
  func.func @transform_10(%arg0: i32) -> (i32, i32) {
    %c0_i32 = arith.constant 0 : i32
    %c0_i32_0 = arith.constant 0 : i32
    %c0_i32_1 = arith.constant 0 : i32
    return %c0_i32, %c0_i32_0 : i32, i32
  }
  func.func @transform_11(%arg0: i32) -> (i32, i32) {
    %c0_i32 = arith.constant 0 : i32
    %c0_i32_0 = arith.constant 0 : i32
    %c0_i32_1 = arith.constant 0 : i32
    return %c0_i32, %c0_i32_0 : i32, i32
  }
  func.func @transform_12(%arg0: i32) -> (i32, i32) {
    %c0_i32 = arith.constant 0 : i32
    %c0_i32_0 = arith.constant 0 : i32
    %c0_i32_1 = arith.constant 0 : i32
    return %c0_i32, %c0_i32_0 : i32, i32
  }
  func.func @transform_13(%arg0: i32) -> (i32, i32, i32) {
    %c0_i32 = arith.constant 0 : i32
    %c0_i32_0 = arith.constant 0 : i32
    %c0_i32_1 = arith.constant 0 : i32
    return %arg0, %c0_i32, %c0_i32_0 : i32, i32, i32
  }
}

</mosaic_0001>

<bundles_post_ra>
// kernel: tpu_custom_call.1
= control target key start
LH: loop header
LB: loop body
LE: loop exit
PB: predicated region body
PF: predicated region fallthrough
CT: control target
= control target key end

     0   :  { %18 = vsyncpa [#allocation3], 0  ;;  %s3775_s0 = inlined_call_operand.vmem [shape: f32[2,8,128], index: 0, kind: input, shape index: {}]   ;;  %s3776_s1 = inlined_call_operand.vmem [shape: bf16[12,128,32], index: 1, kind: input, shape index: {}]   ;;  %s3777_s2 = inlined_call_operand.vmem [shape: f32[12,1,32], index: 2, kind: input, shape index: {}]   ;;  %s3778_s3 = inlined_call_operand.vmem [shape: bf16[4,32,128], index: 3, kind: input, shape index: {}]   ;;  %s3779_s4 = inlined_call_operand.vmem [shape: f32[1,128], index: 4, kind: input, shape index: {}]   ;;  %s3780_s5 = inlined_call_operand.vmem [shape: f32[1,128], index: 5, kind: input, shape index: {}]   ;;  %s3781_s6 = inlined_call_operand.vmem [shape: f32[1,128], index: 6, kind: input, shape index: {}]   ;;  %s3782_s7 = inlined_call_operand.vmem [shape: bf16[128,256], index: 7, kind: input, shape index: {}]   ;;  %s3783_s8 = inlined_call_operand.vmem [shape: f32[1,256], index: 8, kind: input, shape index: {}]   ;;  %s3784_s9 = inlined_call_operand.vmem [shape: bf16[256,128], index: 9, kind: input, shape index: {}]   ;;  %s3785_s10 = inlined_call_operand.vmem [shape: f32[1,128], index: 10, kind: input, shape index: {}]   ;;  %s3786_s11 = inlined_call_operand.vmem [shape: f32[1,128], index: 11, kind: input, shape index: {}]   ;;  %s3787_s12 = inlined_call_operand.vmem [shape: f32[1,128], index: 12, kind: input, shape index: {}]   ;;  %s3788_s13 = inlined_call_operand.hbm [shape: f32[2,8,128], index: 13, kind: output, shape index: {}]  }
   0x1   :  { %20 = vsyncpa [#allocation3 + $0x1], 0  ;;  %s3119_s25 = smov 0   ;;  %s3121_s26 = smov 0  }
   0x2   :  { %s3123_s27 = smov 0   ;;  %s3125_s28 = smov 0  }
   0x3 LB: > { %3793 = sst [smem:[#allocation5_spill]] %s3042_s27  ;;  %s3140_s29 = sadd.s32 4294967295, %s3046_s28   ;;  %s3046_s28 = sphi %s3125_s28, %s3800_s28   ;;  %s3042_s27 = sphi %s3123_s27, %s3802_s27   ;;  %s3038_s26 = sphi %s3121_s26, %s3804_s26   ;;  %s3034_s25 = sphi %s3119_s25, %s3803_s25  }
   0x4   : > { %s2202_s30 = sadd.s32 4294967294, %s3046_s28   ;;  %s3144_s14 = sadd.s32 1, %s3046_s28  }
   0x5   : > { %3794 = sst [smem:[#allocation6_spill]] %s3144_s14  ;;  %s311_s15 = sadd.s32 1, %s3042_s27 }
   0x6   : > { %s308_s16 = ssub.s32 %s3046_s28, %s3144_s14  ;;  %p321_p0 = scmp.ne.s32.totalorder %s3042_s27, %s3038_s26 }
   0x7   : > { %p309_p1 = scmp.eq.s32.totalorder %s308_s16, 0  ;;  %p322_p2 = scmp.eq.s32.totalorder %s3140_s29, 1 }
   0x8   : > { %p327_p3 = scmp.ne.s32.totalorder %s3038_s26, %s3034_s25  ;;  %p328_p4 = scmp.eq.s32.totalorder %s2202_s30, 1 }
   0x9   : > { %s3155_s17 = scalar_select %p309_p1, %s3042_s27, %s311_s15  }
   0xa   : > { %p3157_p5 = por %p322_p2, %p321_p0  ;;  %p3161_p6 = por %p328_p4, %p327_p3 }
   0xb   : > { %3795 = sst [smem:[#allocation7_spill]] %s3155_s17  ;;  %p2205_p7 = scmp.ge.s32.totalorder %s3046_s28, 1 }
   0xc   : > { %s3797_s19 = scalar_select %p3161_p6, 1, 0 }
   0xd   : > { %p389_p8 = scmp.lt.s32.totalorder %s3046_s28, 3 }
   0xe   : > { %3798 = sst [smem:[#allocation8_spill]] %s3797_s19 }
   0xf   : > { %p390_p9 = pnand %p2205_p7, %p389_p8 }
  0x10   : > { %p432_p10 = scmp.lt.s32.totalorder (!%p390_p9), %s3140_s29, 1  ;;  %s429_s15 = sand.u32 (!%p390_p9), 1, %s3038_s26  }
  0x11   : > { %393 = sbr.rel (%p390_p9) target bundleno = 1583 (0x62f), region = 72  ;;  %s2206_s27 = sshll.u32 (!%p390_p9), %s429_s15, 3 }
  0x12   : > { %s2765_s19 = sshll.u32 (!%p390_p9), %s3140_s29, 3  ;;  %s3004_s22 = scalar_lea.hbm (!%p390_p9), %s3788_s13, 16 }
  0x16   : > { %v2775_v0 = vld [vmem:[%s3776_s1 + $0x38] sm:$0xff]  ;;  %v2774_v4 = vld [vmem:[%s3776_s1 + $0x30] sm:$0xff]  ;;  %v2773_v8 = vld [vmem:[%s3776_s1 + $0x28] sm:$0xff]  ;;  %s433_s24 = scalar_select %p432_p10, %s3140_s29, 1  ;;  %vm1419_vm0 = vcmask 261120   ;;  %vm1544_vm1 = vcmask 1043456  }
  0x17   : > { %v2783_v1 = vld [vmem:[%s3776_s1 + $0x78] sm:$0xff]  ;;  %727 = vmatpush.bf16.msra.mxu0 %v2775_v0  ;;  %v2782_v5 = vld [vmem:[%s3776_s1 + $0x70] sm:$0xff]  ;;  %v2781_v9 = vld [vmem:[%s3776_s1 + $0x68] sm:$0xff]  ;;  %vm1496_vm2 = vcmask 64512  }
  0x18   : > { %v2791_v2 = vld [vmem:[%s3776_s1 + $0xb8] sm:$0xff]  ;;  %788 = vmatpush.bf16.msra.mxu1 %v2783_v1  ;;  %v2790_v6 = vld [vmem:[%s3776_s1 + $0xb0] sm:$0xff]  ;;  %v2789_v10 = vld [vmem:[%s3776_s1 + $0xa8] sm:$0xff]  ;;  %s2207_s23 = sshll.u32 %s433_s24, 3  ;;  %s2138_s24 = scalar_lea.hbm %s3788_s13, %s2765_s19 }
  0x19   : > { %v2799_v3 = vld [vmem:[%s3776_s1 + $0xf8] sm:$0xff]  ;;  %849 = vmatpush.bf16.msra.mxu2 %v2791_v2  ;;  %v2798_v7 = vld [vmem:[%s3776_s1 + $0xf0] sm:$0xff]  ;;  %v2797_v11 = vld [vmem:[%s3776_s1 + $0xe8] sm:$0xff]  ;;  %s435_s20 = scalar_lea.vmem %s3775_s0, %s2207_s23  ;;  %s2142_s30 = sshll.u32 %s2138_s24, 4  ;;  %s2143_s30 = int_to_ptr.hbm [resolvable:$true] %s2142_s30 }
  0x1a   : > { %910 = vmatpush.bf16.msra.mxu3 %v2799_v3  ;;  %v2772_v12 = vld [vmem:[%s3776_s1 + $0x20] sm:$0xff]  ;;  %v2771_v16 = vld [vmem:[%s3776_s1 + $0x18] sm:$0xff]  ;;  %v2770_v20 = vld [vmem:[%s3776_s1 + $0x10] sm:$0xff]  ;;  %s2128_s23 = scalar_lea.sflag [#allocation3], %s429_s15  ;;  %s2998_s17 = sshra.s32 %s2143_s30, 4  ;;  %s2999_s17 = int_to_ptr.hbm [resolvable:$true] %s2998_s17 }
  0x1b   : > { %728 = vmatpush.bf16.msra.mxu0 %v2774_v4  ;;  %v2780_v13 = vld [vmem:[%s3776_s1 + $0x60] sm:$0xff]  ;;  %v2779_v17 = vld [vmem:[%s3776_s1 + $0x58] sm:$0xff]  ;;  %v2778_v21 = vld [vmem:[%s3776_s1 + $0x50] sm:$0xff]  ;;  %s3000_s16 = scalar_lea.hbm %s2999_s17, 8  ;;  %p3005_p0 = scmp.lt.s32.totalorder %s2999_s17, %s3788_s13 }
  0x1c   : > { %789 = vmatpush.bf16.msra.mxu1 %v2782_v5  ;;  %v2788_v14 = vld [vmem:[%s3776_s1 + $0xa0] sm:$0xff]  ;;  %v2787_v18 = vld [vmem:[%s3776_s1 + $0x98] sm:$0xff]  ;;  %v2786_v22 = vld [vmem:[%s3776_s1 + $0x90] sm:$0xff]  ;;  %p3001_p11 = scmp.ne.s32.totalorder %s2999_s17, %s3000_s16  ;;  %p3006_p1 = scmp.lt.s32.totalorder %s3004_s22, %s3000_s16 }
  0x1d   : > { %850 = vmatpush.bf16.msra.mxu2 %v2790_v6  ;;  %v2796_v15 = vld [vmem:[%s3776_s1 + $0xe0] sm:$0xff]  ;;  %v2795_v19 = vld [vmem:[%s3776_s1 + $0xd8] sm:$0xff]  ;;  %v2794_v23 = vld [vmem:[%s3776_s1 + $0xd0] sm:$0xff] }
  0x1e   : > { %911 = vmatpush.bf16.msra.mxu3 %v2798_v7  ;;  %v2769_v24 = vld [vmem:[%s3776_s1 + $0x8] sm:$0xff]  ;;  %v2768_v28 = vld [vmem:[%s3776_s1] sm:$0xff]  ;;  %v2807_v33 = vld [vmem:[%s3776_s1 + $0x138] sm:$0xff]  ;;  %p3002_p12 = pnand %p3001_p11, %p3157_p5  ;;  %p3007_p2 = por %p3006_p1, %p3005_p0 }
  0x1f   : > { %729 = vmatpush.bf16.msra.mxu0 %v2773_v8  ;;  %v2777_v25 = vld [vmem:[%s3776_s1 + $0x48] sm:$0xff]  ;;  %v2776_v29 = vld [vmem:[%s3776_s1 + $0x40] sm:$0xff]  ;;  %v2815_v34 = vld [vmem:[%s3776_s1 + $0x178] sm:$0xff] }
  0x20   : > { %790 = vmatpush.bf16.msra.mxu1 %v2781_v9  ;;  %v2785_v26 = vld [vmem:[%s3776_s1 + $0x88] sm:$0xff]  ;;  %v2784_v30 = vld [vmem:[%s3776_s1 + $0x80] sm:$0xff]  ;;  %v2823_v35 = vld [vmem:[%s3776_s1 + $0x1b8] sm:$0xff]  ;;  %p3003_p13 = pneg %p3002_p12 }
  0x21   : > { %851 = vmatpush.bf16.msra.mxu2 %v2789_v10  ;;  %v2793_v27 = vld [vmem:[%s3776_s1 + $0xc8] sm:$0xff]  ;;  %v2792_v31 = vld [vmem:[%s3776_s1 + $0xc0] sm:$0xff]  ;;  %v2831_v36 = vld [vmem:[%s3776_s1 + $0x1f8] sm:$0xff] }
  0x22   : > { %912 = vmatpush.bf16.msra.mxu3 %v2797_v11  ;;  %v3268_v32 = vld [vmem:[%s435_s20] sm:$0xff]  ;;  %v2806_v38 = vld [vmem:[%s3776_s1 + $0x130] sm:$0xff]  ;;  %v2805_v42 = vld [vmem:[%s3776_s1 + $0x128] sm:$0xff]  ;;  %s431_s20 = scalar_lea.vmem [#allocation2], %s2206_s27  ;;  %p3008_p3 = pnand %p3007_p2, %p3003_p13 }
  0x23   : > { %730 = vmatpush.bf16.msra.mxu0 %v2772_v12  ;;  %v3284_v37 = vpack.c.bf16 %v3268_v32, %v3268_v32  ;;  %v2814_v39 = vld [vmem:[%s3776_s1 + $0x170] sm:$0xff]  ;;  %v2813_v43 = vld [vmem:[%s3776_s1 + $0x168] sm:$0xff]  ;;  %v2804_v46 = vld [vmem:[%s3776_s1 + $0x120] sm:$0xff]  ;;  %s2140_s29 = sshll.u32 %s431_s20, 4  ;;  %s2141_s29 = int_to_ptr.vmem [resolvable:$true] %s2140_s29 }
  0x24   : > { %791 = vmatpush.bf16.msra.mxu1 %v2780_v13  ;;  %v2822_v40 = vld [vmem:[%s3776_s1 + $0x1b0] sm:$0xff]  ;;  %v2821_v44 = vld [vmem:[%s3776_s1 + $0x1a8] sm:$0xff]  ;;  %v2812_v47 = vld [vmem:[%s3776_s1 + $0x160] sm:$0xff] }
  0x25   : > { %852 = vmatpush.bf16.msra.mxu2 %v2788_v14  ;;  %v2830_v41 = vld [vmem:[%s3776_s1 + $0x1f0] sm:$0xff]  ;;  %v2829_v45 = vld [vmem:[%s3776_s1 + $0x1e8] sm:$0xff]  ;;  %v2820_v48 = vld [vmem:[%s3776_s1 + $0x1a0] sm:$0xff] }
  0x26   : > { %913 = vmatpush.bf16.msra.mxu3 %v2796_v15  ;;  %v2828_v49 = vld [vmem:[%s3776_s1 + $0x1e0] sm:$0xff]  ;;  %v2803_v50 = vld [vmem:[%s3776_s1 + $0x118] sm:$0xff]  ;;  %v2802_v54 = vld [vmem:[%s3776_s1 + $0x110] sm:$0xff] }
  0x27   : > { %731 = vmatpush.bf16.msra.mxu0 %v2771_v16  ;;  %v2811_v51 = vld [vmem:[%s3776_s1 + $0x158] sm:$0xff]  ;;  %v2810_v55 = vld [vmem:[%s3776_s1 + $0x150] sm:$0xff]  ;;  %v2801_v58 = vld [vmem:[%s3776_s1 + $0x108] sm:$0xff] }
  0x28   : > { %792 = vmatpush.bf16.msra.mxu1 %v2779_v17  ;;  %v2819_v52 = vld [vmem:[%s3776_s1 + $0x198] sm:$0xff]  ;;  %v2818_v56 = vld [vmem:[%s3776_s1 + $0x190] sm:$0xff]  ;;  %v2809_v59 = vld [vmem:[%s3776_s1 + $0x148] sm:$0xff] }
  0x29   : > { %853 = vmatpush.bf16.msra.mxu2 %v2787_v18  ;;  %v2827_v53 = vld [vmem:[%s3776_s1 + $0x1d8] sm:$0xff]  ;;  %v2826_v57 = vld [vmem:[%s3776_s1 + $0x1d0] sm:$0xff]  ;;  %v2817_v60 = vld [vmem:[%s3776_s1 + $0x188] sm:$0xff] }
  0x2a   : > { %914 = vmatpush.bf16.msra.mxu3 %v2795_v19  ;;  %v2825_v61 = vld [vmem:[%s3776_s1 + $0x1c8] sm:$0xff]  ;;  %v2800_v62 = vld [vmem:[%s3776_s1 + $0x100] sm:$0xff]  ;;  %v2839_v2 = vld [vmem:[%s3776_s1 + $0x238] sm:$0xff] }
  0x2b   : > { %732 = vmatpush.bf16.msra.mxu0 %v2770_v20  ;;  %v2808_v63 = vld [vmem:[%s3776_s1 + $0x140] sm:$0xff]  ;;  %v2847_v3 = vld [vmem:[%s3776_s1 + $0x278] sm:$0xff]  ;;  %v2838_v6 = vld [vmem:[%s3776_s1 + $0x230] sm:$0xff] }
  0x2c   : > { %793 = vmatpush.bf16.msra.mxu1 %v2778_v21  ;;  %v2816_v0 = vld [vmem:[%s3776_s1 + $0x180] sm:$0xff]  ;;  %v2855_v4 = vld [vmem:[%s3776_s1 + $0x2b8] sm:$0xff]  ;;  %v2846_v7 = vld [vmem:[%s3776_s1 + $0x270] sm:$0xff] }
  0x2d   : > { %854 = vmatpush.bf16.msra.mxu2 %v2786_v22  ;;  %v2824_v1 = vld [vmem:[%s3776_s1 + $0x1c0] sm:$0xff]  ;;  %v2863_v5 = vld [vmem:[%s3776_s1 + $0x2f8] sm:$0xff]  ;;  %v2854_v8 = vld [vmem:[%s3776_s1 + $0x2b0] sm:$0xff] }
  0x2e   : > { %915 = vmatpush.bf16.msra.mxu3 %v2794_v23  ;;  %v2862_v9 = vld [vmem:[%s3776_s1 + $0x2f0] sm:$0xff]  ;;  %v2837_v10 = vld [vmem:[%s3776_s1 + $0x228] sm:$0xff]  ;;  %v2836_v14 = vld [vmem:[%s3776_s1 + $0x220] sm:$0xff] }
  0x2f   : > { %733 = vmatpush.bf16.msra.mxu0 %v2769_v24  ;;  %v2845_v11 = vld [vmem:[%s3776_s1 + $0x268] sm:$0xff]  ;;  %v2844_v15 = vld [vmem:[%s3776_s1 + $0x260] sm:$0xff]  ;;  %v2851_v17 = vld [vmem:[%s3776_s1 + $0x298] sm:$0xff] }
  0x30   : > { %794 = vmatpush.bf16.msra.mxu1 %v2777_v25  ;;  %v2853_v12 = vld [vmem:[%s3776_s1 + $0x2a8] sm:$0xff]  ;;  %v2852_v16 = vld [vmem:[%s3776_s1 + $0x2a0] sm:$0xff]  ;;  %v2835_v18 = vld [vmem:[%s3776_s1 + $0x218] sm:$0xff] }
  0x31   : > { %855 = vmatpush.bf16.msra.mxu2 %v2785_v26  ;;  %v2861_v13 = vld [vmem:[%s3776_s1 + $0x2e8] sm:$0xff]  ;;  %v2843_v19 = vld [vmem:[%s3776_s1 + $0x258] sm:$0xff]  ;;  %v2860_v20 = vld [vmem:[%s3776_s1 + $0x2e0] sm:$0xff] }
  0x32   : > { %916 = vmatpush.bf16.msra.mxu3 %v2793_v27  ;;  %v2834_v21 = vld [vmem:[%s3776_s1 + $0x210] sm:$0xff]  ;;  %v2859_v23 = vld [vmem:[%s3776_s1 + $0x2d8] sm:$0xff]  ;;  %v2833_v25 = vld [vmem:[%s3776_s1 + $0x208] sm:$0xff] }
  0x33   : > { %734 = vmatpush.bf16.msra.mxu0 %v2768_v28  ;;  %v2842_v22 = vld [vmem:[%s3776_s1 + $0x250] sm:$0xff]  ;;  %v2841_v26 = vld [vmem:[%s3776_s1 + $0x248] sm:$0xff] }
  0x34   : > { %795 = vmatpush.bf16.msra.mxu1 %v2776_v29  ;;  %v2850_v24 = vld [vmem:[%s3776_s1 + $0x290] sm:$0xff]  ;;  %v2849_v28 = vld [vmem:[%s3776_s1 + $0x288] sm:$0xff]  ;;  %v2832_v29 = vld [vmem:[%s3776_s1 + $0x200] sm:$0xff] }
  0x35   : > { %856 = vmatpush.bf16.msra.mxu2 %v2784_v30  ;;  %v2858_v27 = vld [vmem:[%s3776_s1 + $0x2d0] sm:$0xff]  ;;  %v2840_v30 = vld [vmem:[%s3776_s1 + $0x240] sm:$0xff] }
  0x36   : > { %917 = vmatpush.bf16.msra.mxu3 %v2792_v31  ;;  %735 = vmatmul.bf16.vlgmr.msra.gmra.mxu0 %v3284_v37  ;;  %v2857_v31 = vld [vmem:[%s3776_s1 + $0x2c8] sm:$0xff] }
  0x37   : > { %971 = vmatpush.bf16.msrb.mxu0 %v2807_v33  ;;  %796 = vmatmul.bf16.vlgmr.msra.gmra.mxu1 %v3284_v37  ;;  %v2848_v33 = vld [vmem:[%s3776_s1 + $0x280] sm:$0xff] }
  0x38   : > { %1032 = vmatpush.bf16.msrb.mxu1 %v2815_v34  ;;  %857 = vmatmul.bf16.vlgmr.msra.gmra.mxu2 %v3284_v37  ;;  %v2856_v34 = vld [vmem:[%s3776_s1 + $0x2c0] sm:$0xff] }
  0x39   : > { %1093 = vmatpush.bf16.msrb.mxu2 %v2823_v35  ;;  %918 = vmatmul.bf16.vlgmr.msra.gmra.mxu3 %v3284_v37 }
  0x3a   : > { %1154 = vmatpush.bf16.msrb.mxu3 %v2831_v36 }
  0x3b   : > { %972 = vmatpush.bf16.msrb.mxu0 %v2806_v38 }
  0x3c   : > { %1033 = vmatpush.bf16.msrb.mxu1 %v2814_v39 }
  0x3d   : > { %1094 = vmatpush.bf16.msrb.mxu2 %v2822_v40 }
  0x3e   : > { %1155 = vmatpush.bf16.msrb.mxu3 %v2830_v41 }
  0x3f   : > { %973 = vmatpush.bf16.msrb.mxu0 %v2805_v42 }
  0x40   : > { %1034 = vmatpush.bf16.msrb.mxu1 %v2813_v43 }
  0x41   : > { %1095 = vmatpush.bf16.msrb.mxu2 %v2821_v44  ;;  %v2948_v44 = vld [vmem:[%s3777_s2 + $0x4] ss:$0 sm:$0xff] }
  0x42   : > { %1156 = vmatpush.bf16.msrb.mxu3 %v2829_v45  ;;  %v2949_v45 = vld [vmem:[%s3777_s2 + $0x5] ss:$0 sm:$0xff] }
  0x43   : > { %974 = vmatpush.bf16.msrb.mxu0 %v2804_v46 }
  0x44   : > { %1035 = vmatpush.bf16.msrb.mxu1 %v2812_v47 }
  0x45   : > { %1096 = vmatpush.bf16.msrb.mxu2 %v2820_v48 }
  0x46   : > { %1157 = vmatpush.bf16.msrb.mxu3 %v2828_v49 }
  0x47   : > { %975 = vmatpush.bf16.msrb.mxu0 %v2803_v50 }
  0x48   : > { %1036 = vmatpush.bf16.msrb.mxu1 %v2811_v51 }
  0x49   : > { %1097 = vmatpush.bf16.msrb.mxu2 %v2819_v52  ;;  %v2945_v52 = vld [vmem:[%s3777_s2] ss:$0 sm:$0xff] }
  0x4a   : > { %1158 = vmatpush.bf16.msrb.mxu3 %v2827_v53  ;;  %v2950_v53 = vld [vmem:[%s3777_s2 + $0x6] ss:$0 sm:$0xff] }
  0x4b   : > { %976 = vmatpush.bf16.msrb.mxu0 %v2802_v54  ;;  %v2951_v54 = vld [vmem:[%s3777_s2 + $0x7] ss:$0 sm:$0xff] }
  0x4c   : > { %1037 = vmatpush.bf16.msrb.mxu1 %v2810_v55 }
  0x4d   : > { %1098 = vmatpush.bf16.msrb.mxu2 %v2818_v56 }
  0x4e   : > { %1159 = vmatpush.bf16.msrb.mxu3 %v2826_v57 }
  0x4f   : > { %977 = vmatpush.bf16.msrb.mxu0 %v2801_v58 }
  0x50   : > { %1038 = vmatpush.bf16.msrb.mxu1 %v2809_v59 }
  0x51   : > { %1099 = vmatpush.bf16.msrb.mxu2 %v2817_v60 }
  0x52   : > { %1160 = vmatpush.bf16.msrb.mxu3 %v2825_v61 }
  0x53   : > { %978 = vmatpush.bf16.msrb.mxu0 %v2800_v62 }
  0x54   : > { %1039 = vmatpush.bf16.msrb.mxu1 %v2808_v63 }
  0x55   : > { %1100 = vmatpush.bf16.msrb.mxu2 %v2816_v0 }
  0x56   : > { %1161 = vmatpush.bf16.msrb.mxu3 %v2824_v1  ;;  %979 = vmatmul.bf16.vlgmr.msrb.gmra.mxu0 %v3284_v37  ;;  %v2944_v1 = vld [vmem:[%s3777_s2 + $0x2] ss:$0 sm:$0xff] }
  0x57   : > { %1215 = vmatpush.bf16.msra.mxu0 %v2839_v2  ;;  %1040 = vmatmul.bf16.vlgmr.msrb.gmra.mxu1 %v3284_v37 }
  0x58   : > { %1276 = vmatpush.bf16.msra.mxu1 %v2847_v3  ;;  %1101 = vmatmul.bf16.vlgmr.msrb.gmra.mxu2 %v3284_v37  ;;  %v2947_v3 = vld [vmem:[%s3777_s2 + $0x3] ss:$0 sm:$0xff] }
  0x59   : > { %1162 = vmatmul.bf16.vlgmr.msrb.gmra.mxu3 %v3284_v37  ;;  %1337 = vmatpush.bf16.msra.mxu2 %v2855_v4 }
  0x5a   : > { %1398 = vmatpush.bf16.msra.mxu3 %v2863_v5 }
  0x5b   : > { %1216 = vmatpush.bf16.msra.mxu0 %v2838_v6 }
  0x5c   : > { %1277 = vmatpush.bf16.msra.mxu1 %v2846_v7 }
  0x5d   : > { %1338 = vmatpush.bf16.msra.mxu2 %v2854_v8 }
  0x5e   : > { %1399 = vmatpush.bf16.msra.mxu3 %v2862_v9 }
  0x5f   : > { %1217 = vmatpush.bf16.msra.mxu0 %v2837_v10 }
  0x60   : > { %1278 = vmatpush.bf16.msra.mxu1 %v2845_v11 }
  0x61   : > { %1339 = vmatpush.bf16.msra.mxu2 %v2853_v12 }
  0x62   : > { %1400 = vmatpush.bf16.msra.mxu3 %v2861_v13 }
  0x63   : > { %1218 = vmatpush.bf16.msra.mxu0 %v2836_v14 }
  0x64   : > { %1279 = vmatpush.bf16.msra.mxu1 %v2844_v15  ;;  %v2952_v15 = vld [vmem:[%s3777_s2 + $0x8] ss:$0 sm:$0xff] }
  0x65   : > { %1340 = vmatpush.bf16.msra.mxu2 %v2852_v16  ;;  %v2953_v16 = vld [vmem:[%s3777_s2 + $0x9] ss:$0 sm:$0xff] }
  0x66   : > { %1401 = vmatpush.bf16.msra.mxu3 %v2860_v20 }
  0x67   : > { %1219 = vmatpush.bf16.msra.mxu0 %v2835_v18 }
  0x68   : > { %1280 = vmatpush.bf16.msra.mxu1 %v2843_v19 }
  0x69   : > { %1341 = vmatpush.bf16.msra.mxu2 %v2851_v17 }
  0x6a   : > { %1402 = vmatpush.bf16.msra.mxu3 %v2859_v23 }
  0x6b   : > { %1220 = vmatpush.bf16.msra.mxu0 %v2834_v21  ;;  %v2954_v21 = vld [vmem:[%s3777_s2 + $0xa] ss:$0 sm:$0xff] }
  0x6c   : > { %1281 = vmatpush.bf16.msra.mxu1 %v2842_v22 }
  0x6d   : > { %1342 = vmatpush.bf16.msra.mxu2 %v2850_v24 }
  0x6e   : > { %1403 = vmatpush.bf16.msra.mxu3 %v2858_v27 }
  0x6f   : > { %1221 = vmatpush.bf16.msra.mxu0 %v2833_v25 }
  0x70   : > { %1282 = vmatpush.bf16.msra.mxu1 %v2841_v26 }
  0x71   : > { %1343 = vmatpush.bf16.msra.mxu2 %v2849_v28 }
  0x72   : > { %1404 = vmatpush.bf16.msra.mxu3 %v2857_v31 }
  0x73   : > { %1222 = vmatpush.bf16.msra.mxu0 %v2832_v29 }
  0x74   : > { %1283 = vmatpush.bf16.msra.mxu1 %v2840_v30 }
  0x75   : > { %1344 = vmatpush.bf16.msra.mxu2 %v2848_v33  ;;  %v2955_v33 = vld [vmem:[%s3777_s2 + $0xb] ss:$0 sm:$0xff] }
  0x76   : > { %1223 = vmatmul.bf16.vlgmr.msra.gmra.mxu0 %v3284_v37  ;;  %1405 = vmatpush.bf16.msra.mxu3 %v2856_v34 }
  0x77   : > { %1284 = vmatmul.bf16.vlgmr.msra.gmra.mxu1 %v3284_v37 }
  0x78   : > { %1345 = vmatmul.bf16.vlgmr.msra.gmra.mxu2 %v3284_v37 }
  0x79   : > { %1406 = vmatmul.bf16.vlgmr.msra.gmra.mxu3 %v3284_v37  ;;  %v2946_v37 = vld [vmem:[%s3777_s2 + $0x1] ss:$0 sm:$0xff] }
  0xb3   : > { %v736_v35 = vpop.f32.mrf.mxu0 }
  0xb4   : > { %v797_v36 = vpop.f32.mrf.mxu1  ;;  %v737_v60 = vadd.f32 %v2945_v52, %v736_v35 }
  0xb5   : > { %v798_v57 = vadd.f32 %v2946_v37, %v797_v36 }
  0xb6   : > { %v1411_v6 = vpack.c.bf16 %v737_v60, %v737_v60 }
  0xb7   : > { %v1412_v2 = vpack.c.bf16 %v798_v57, %v798_v57 }
  0xbb   : > { %v858_v38 = vpop.f32.mrf.mxu2  ;;  %v738_v40 = vpop.f32.mrf.mxu0 }
  0xbc   : > { %v919_v39 = vpop.f32.mrf.mxu3  ;;  %v799_v41 = vpop.f32.mrf.mxu1  ;;  %v859_v9 = vadd.f32 %v2944_v1, %v858_v38 }
  0xbd   : > { %v920_v10 = vadd.f32 %v2947_v3, %v919_v39 }
  0xbe   : > { %v1413_v13 = vpack.c.bf16 %v859_v9, %v859_v9 }
  0xbf   : > { %v1414_v14 = vpack.c.bf16 %v920_v10, %v920_v10 }
  0xc3   : > { %v860_v42 = vpop.f32.mrf.mxu2 }
  0xc4   : > { %v921_v43 = vpop.f32.mrf.mxu3 }
  0xd3   : > { %v980_v46 = vpop.f32.mrf.mxu0 }
  0xd4   : > { %v1041_v47 = vpop.f32.mrf.mxu1  ;;  %v981_v48 = vadd.f32 %v2948_v44, %v980_v46 }
  0xd5   : > { %v1042_v49 = vadd.f32 %v2949_v45, %v1041_v47 }
  0xd6   : > { %v1415_v50 = vpack.c.bf16 %v981_v48, %v981_v48 }
  0xd7   : > { %v1416_v51 = vpack.c.bf16 %v1042_v49, %v1042_v49 }
  0xd8   : > { %v1424_v55 = vsel %vm1419_vm0, %v1415_v50, 0 }
  0xd9   : > { %v1443_v56 = vsel %vm1419_vm0, %v1416_v51, 0  ;;  %1433 = vmatpush.bf16.xpose.msrb.mxu0 %v1424_v55 }
  0xda   : > { %1452 = vmatpush.bf16.xpose.msrb.mxu1 %v1443_v56 }
  0xdb   : > { %v1102_v58 = vpop.f32.mrf.mxu2  ;;  %v982_v63 = vpop.f32.mrf.mxu0 }
  0xdc   : > { %v1163_v59 = vpop.f32.mrf.mxu3  ;;  %v1103_v61 = vadd.f32 %v2950_v53, %v1102_v58  ;;  %v1043_v0 = vpop.f32.mrf.mxu1 }
  0xdd   : > { %v1164_v62 = vadd.f32 %v2951_v54, %v1163_v59 }
  0xde   : > { %v1417_v4 = vpack.c.bf16 %v1103_v61, %v1103_v61 }
  0xdf   : > { %v1418_v5 = vpack.c.bf16 %v1164_v62, %v1164_v62 }
  0xe0   : > { %v1462_v7 = vsel %vm1419_vm0, %v1417_v4, 0  ;;  %2592 = vmatmul.msk.bf16.vlgmr.msrb.gmra.mxu0 %vm1419_vm0, %v1411_v6 }
  0xe1   : > { %v1481_v8 = vsel %vm1419_vm0, %v1418_v5, 0  ;;  %1471 = vmatpush.bf16.xpose.msrb.mxu2 %v1462_v7  ;;  %2593 = vmatmul.msk.bf16.vlgmr.msrb.gmra.mxu1 %vm1419_vm0, %v1412_v2 }
  0xe2   : > { %1490 = vmatpush.bf16.xpose.msrb.mxu3 %v1481_v8 }
  0xe3   : > { %v1104_v11 = vpop.f32.mrf.mxu2 }
  0xe4   : > { %v1165_v12 = vpop.f32.mrf.mxu3 }
  0xe5   : > { %v2865_v12 = vld [vmem:[%s3778_s3 + $0x8] sm:$0xff] }
  0xe8   : > { %2594 = vmatmul.msk.bf16.vlgmr.msrb.gmra.mxu2 %vm1419_vm0, %v1413_v13  ;;  %v2864_v13 = vld [vmem:[%s3778_s3] sm:$0xff] }
  0xe9   : > { %2595 = vmatmul.msk.bf16.vlgmr.msrb.gmra.mxu3 %vm1419_vm0, %v1414_v14  ;;  %v2867_v14 = vld [vmem:[%s3778_s3 + $0x18] sm:$0xff] }
  0xf3   : > { %v1224_v17 = vpop.f32.mrf.mxu0 }
  0xf4   : > { %v1285_v18 = vpop.f32.mrf.mxu1  ;;  %v1225_v19 = vadd.f32 %v2952_v15, %v1224_v17  ;;  %v2866_v15 = vld [vmem:[%s3778_s3 + $0x10] sm:$0xff]  ;;  %v2868_v17 = vld [vmem:[%s3778_s3 + $0x20] sm:$0xff] }
  0xf5   : > { %v1286_v20 = vadd.f32 %v2953_v16, %v1285_v18  ;;  %v2869_v16 = vld [vmem:[%s3778_s3 + $0x28] sm:$0xff]  ;;  %v2871_v18 = vld [vmem:[%s3778_s3 + $0x38] sm:$0xff] }
  0xf6   : > { %v1537_v22 = vpack.c.bf16 %v1225_v19, %v1225_v19 }
  0xf7   : > { %v1538_v23 = vpack.c.bf16 %v1286_v20, %v1286_v20  ;;  %v2870_v20 = vld [vmem:[%s3778_s3 + $0x30] sm:$0xff] }
  0xf8   : > { %v1546_v24 = vsel %vm1544_vm1, %v1537_v22, 0 }
  0xf9   : > { %v1565_v25 = vsel %vm1544_vm1, %v1538_v23, 0  ;;  %1555 = vmatpush.bf16.msra.mxu0 %v1546_v24 }
  0xfa   : > { %1574 = vmatpush.bf16.msra.mxu1 %v1565_v25 }
  0xfb   : > { %v1346_v26 = vpop.f32.mrf.mxu2  ;;  %v1226_v28 = vpop.f32.mrf.mxu0 }
  0xfc   : > { %v1347_v27 = vadd.f32 %v2954_v21, %v1346_v26  ;;  %v1287_v29 = vpop.f32.mrf.mxu1  ;;  %v1407_v34 = vpop.f32.mrf.mxu3 }
  0xfd   : > { %v1408_v36 = vadd.f32 %v2955_v33, %v1407_v34  ;;  %1667 = vmatpush.bf16.msrb.mxu0 %v2865_v12  ;;  %v2885_v12 = vld [vmem:[%s3782_s7 + $0x64] sm:$0xf0] }
  0xfe   : > { %v1539_v30 = vpack.c.bf16 %v1347_v27, %v1347_v27  ;;  %1695 = vmatpush.bf16.msrb.mxu1 %v2867_v14 }
  0xff   : > { %v1540_v38 = vpack.c.bf16 %v1408_v36, %v1408_v36 }
 0x100   : > { %v1584_v31 = vsel %vm1544_vm1, %v1539_v30, 0 }
 0x101   : > { %1593 = vmatpush.bf16.msra.mxu2 %v1584_v31  ;;  %v1603_v39 = vsel %vm1544_vm1, %v1540_v38, 0  ;;  %1668 = vmatpush.bf16.msrb.mxu0 %v2864_v13  ;;  %v2884_v13 = vld [vmem:[%s3782_s7 + $0x64] sm:$0xf] }
 0x102   : > { %1612 = vmatpush.bf16.msra.mxu3 %v1603_v39  ;;  %1696 = vmatpush.bf16.msrb.mxu1 %v2866_v15  ;;  %v2688_v15 = vld [vmem:[%s3782_s7 + $0x68] sm:$0xf0] }
 0x103   : > { %v1348_v35 = vpop.f32.mrf.mxu2 }
 0x104   : > { %v1409_v40 = vpop.f32.mrf.mxu3 }
 0x105   : > { %1723 = vmatpush.bf16.msrb.mxu2 %v2869_v16  ;;  %v2691_v16 = vor.u32 %v2884_v13, %v2688_v15  ;;  %v2958_v15 = vld [vmem:[%s3781_s6] ss:$0 sm:$0xff] }
 0x106   : > { %1751 = vmatpush.bf16.msrb.mxu3 %v2871_v18  ;;  %v2883_v18 = vld [vmem:[%s3782_s7 + $0x54] sm:$0xf0] }
 0x109   : > { %1724 = vmatpush.bf16.msrb.mxu2 %v2868_v17  ;;  %v2678_v17 = vld [vmem:[%s3782_s7 + $0x50] sm:$0xf] }
 0x10a   : > { %1752 = vmatpush.bf16.msrb.mxu3 %v2870_v20  ;;  %v2679_v20 = vor.u32 %v2883_v18, %v2678_v17 }
 0x15d   : > { %v1435_v41 = vpop.f32.mrf.mxu0 }
 0x15e   : > { %v1454_v42 = vpop.f32.mrf.mxu1  ;;  %v1497_v43 = vsel %vm1496_vm2, %v1435_v41, -inf }
 0x15f   : > { %1498 = vmax.xlane.f32.xlu1 %v1497_v43  ;;  %v1500_v46 = vsel %vm1496_vm2, %v1454_v42, -inf }
 0x165   : > { %v1437_v44 = vpop.f32.mrf.mxu0 }
 0x166   : > { %v1456_v45 = vpop.f32.mrf.mxu1 }
 0x167   : > { %1501 = vmax.xlane.f32.xlu1 %v1500_v46 }
 0x16b   : > { %v1473_v47 = vpop.f32.mrf.mxu2 }
 0x16c   : > { %v1492_v48 = vpop.f32.mrf.mxu3  ;;  %v1503_v49 = vsel %vm1496_vm2, %v1473_v47, -inf }
 0x16d   : > { %1504 = vmax.xlane.f32.xlu0 %v1503_v49  ;;  %v1506_v51 = vsel %vm1496_vm2, %v1492_v48, -inf }
 0x173   : > { %v1475_v37 = vpop.f32.mrf.mxu2 }
 0x174   : > { %v1494_v50 = vpop.f32.mrf.mxu3 }
 0x175   : > { %1507 = vmax.xlane.f32.xlu0 %v1506_v51 }
 0x1d2   : > { %v1499_v52 = vpop.xlane.xlu1 %1498 }
 0x1d3   : > { %v1509_v53 = vsub.f32 %v1435_v41, %v1499_v52  ;;  %v2956_v52 = vld [vmem:[%s3779_s4] ss:$0 sm:$0xff] }
 0x1d5   : > { %v1513_v54 = vmul.f32 1.442695, %v1509_v53 }
 0x1d7   : > { %2962 = vpow2.f32 %v1513_v54 }
 0x1da   : > { %v1502_v55 = vpop.xlane.xlu1 %1501 }
 0x1db   : > { %v1510_v56 = vsub.f32 %v1454_v42, %v1502_v55 }
 0x1dd   : > { %v2963_v57 = vpop.eup %2962  ;;  %v1515_v58 = vmul.f32 1.442695, %v1510_v56 }
 0x1de   : > { %v1533_v59 = vpack.c.bf16 %v2963_v57, %v2963_v57  ;;  %v1521_v61 = vsel %vm1496_vm2, %v2963_v57, 0.0 }
 0x1df   : > { %2964 = vpow2.f32 %v1515_v58  ;;  %1522 = vadd.xlane.f32.xlu0 %v1521_v61  ;;  %v2887_v61 = vld [vmem:[%s3782_s7 + $0x74] sm:$0xf0] }
 0x1e0   : > { %v1505_v60 = vpop.xlane.xlu0 %1504  ;;  %2596 = vmatmul.msk.bf16.vlgmr.msra.gmra.mxu0 %vm1496_vm2, %v1533_v59  ;;  %v3048_v59 = vmov 128.0  }
 0x1e1   : > { %v1511_v62 = vsub.f32 %v1473_v47, %v1505_v60  ;;  %v2694_v60 = vld [vmem:[%s3782_s7 + $0x70] sm:$0xf] }
 0x1e3   : > { %v1517_v63 = vmul.f32 1.442695, %v1511_v62  ;;  %v2886_v62 = vld [vmem:[%s3782_s7 + $0x74] sm:$0xf] }
 0x1e5   : > { %2966 = vpow2.f32 %v1517_v63  ;;  %v2965_v0 = vpop.eup %2964  ;;  %v2695_v63 = vor.u32 %v2887_v61, %v2694_v60  ;;  %v2893_v61 = vld [vmem:[%s3784_s9 + $0x28] sm:$0xff] }
 0x1e6   : > { %v1534_v1 = vpack.c.bf16 %v2965_v0, %v2965_v0  ;;  %v1524_v3 = vsel %vm1496_vm2, %v2965_v0, 0.0 }
 0x1e7   : > { %1525 = vadd.xlane.f32.xlu1 %v1524_v3  ;;  %1907 = vmatpush.bf16.msra.mxu0 %v2695_v63  ;;  %v2892_v63 = vld [vmem:[%s3784_s9 + $0x20] sm:$0xff] }
 0x1e8   : > { %v1508_v2 = vpop.xlane.xlu0 %1507  ;;  %2597 = vmatmul.msk.bf16.vlgmr.msra.gmra.mxu1 %vm1496_vm2, %v1534_v1 }
 0x1e9   : > { %v1512_v4 = vsub.f32 %v1492_v48, %v1508_v2 }
 0x1eb   : > { %v2967_v5 = vpop.eup %2966  ;;  %v1519_v6 = vmul.f32 1.442695, %v1512_v4 }
 0x1ec   : > { %v1535_v7 = vpack.c.bf16 %v2967_v5, %v2967_v5  ;;  %v1527_v8 = vsel %vm1496_vm2, %v2967_v5, 0.0 }
 0x1ed   : > { %2968 = vpow2.f32 %v1519_v6  ;;  %1528 = vadd.xlane.f32.xlu2 %v1527_v8 }
 0x1ee   : > { %2598 = vmatmul.msk.bf16.vlgmr.msra.gmra.mxu2 %vm1496_vm2, %v1535_v7 }
 0x1f3   : > { %v2969_v9 = vpop.eup %2968 }
 0x1f4   : > { %v1536_v10 = vpack.c.bf16 %v2969_v9, %v2969_v9  ;;  %v1530_v11 = vsel %vm1496_vm2, %v2969_v9, 0.0 }
 0x1f5   : > { %1531 = vadd.xlane.f32.xlu2 %v1530_v11  ;;  %v2686_v11 = vld [vmem:[%s3782_s7 + $0x60] sm:$0xf] }
 0x1f6   : > { %2599 = vmatmul.msk.bf16.vlgmr.msra.gmra.mxu3 %vm1496_vm2, %v1536_v10  ;;  %v2687_v14 = vor.u32 %v2885_v12, %v2686_v11  ;;  %v2957_v12 = vld [vmem:[%s3780_s5] ss:$0 sm:$0xff] }
 0x1f8   : > { %1908 = vmatpush.bf16.msra.mxu0 %v2687_v14 }
 0x1fc   : > { %1909 = vmatpush.bf16.msra.mxu0 %v2679_v20  ;;  %v2897_v20 = vld [vmem:[%s3784_s9 + $0x48] sm:$0xff] }
 0x252   : > { %v1523_v19 = vpop.xlane.xlu0 %1522 }
 0x253   : > { %2970 = vrcp.f32 %v1523_v19  ;;  %v2882_v19 = vld [vmem:[%s3782_s7 + $0x54] sm:$0xf] }
 0x259   : > { %v2971_v22 = vpop.eup %2970 }
 0x25a   : > { %v1526_v21 = vpop.xlane.xlu1 %1525 }
 0x25b   : > { %2972 = vrcp.f32 %v1526_v21  ;;  %v2680_v21 = vld [vmem:[%s3782_s7 + $0x58] sm:$0xf0] }
 0x25d   : > { %v1557_v23 = vpop.f32.mrf.mxu0 }
 0x25e   : > { %v1622_v24 = vmul.f32 %v2971_v22, %v1557_v23  ;;  %v2683_v22 = vor.u32 %v2882_v19, %v2680_v21  ;;  %v2670_v23 = vld [vmem:[%s3782_s7 + $0x40] sm:$0xf]  ;;  %v2889_v19 = vld [vmem:[%s3784_s9 + $0x8] sm:$0xff] }
 0x25f   : > { %v2896_v21 = vld [vmem:[%s3784_s9 + $0x40] sm:$0xff] }
 0x260   : > { %v1626_v25 = vpack.c.bf16 %v1622_v24, %v1622_v24  ;;  %v1529_v26 = vpop.xlane.xlu2 %1528  ;;  %v2881_v24 = vld [vmem:[%s3782_s7 + $0x44] sm:$0xf0] }
 0x261   : > { %v2973_v27 = vpop.eup %2972  ;;  %2974 = vrcp.f32 %v1529_v26  ;;  %v2671_v26 = vor.u32 %v2881_v24, %v2670_v23 }
 0x262   : > { %2608 = vmatmul.msk.bf16.vlgmr.msrb.gmra.mxu0 %vm1419_vm0, %v1626_v25  ;;  %v2880_v25 = vld [vmem:[%s3782_s7 + $0x44] sm:$0xf] }
 0x263   : > { %1910 = vmatpush.bf16.msra.mxu0 %v2671_v26 }
 0x265   : > { %v1559_v28 = vpop.f32.mrf.mxu0  ;;  %v1576_v29 = vpop.f32.mrf.mxu1 }
 0x266   : > { %v1623_v30 = vmul.f32 %v2973_v27, %v1576_v29  ;;  %v2672_v27 = vld [vmem:[%s3782_s7 + $0x48] sm:$0xf0]  ;;  %v2662_v29 = vld [vmem:[%s3782_s7 + $0x30] sm:$0xf] }
 0x267   : > { %v2975_v35 = vpop.eup %2974  ;;  %v2675_v28 = vor.u32 %v2880_v25, %v2672_v27 }
 0x268   : > { %v1627_v31 = vpack.c.bf16 %v1623_v30, %v1623_v30  ;;  %v1532_v34 = vpop.xlane.xlu2 %1531  ;;  %v2879_v30 = vld [vmem:[%s3782_s7 + $0x34] sm:$0xf0] }
 0x269   : > { %2976 = vrcp.f32 %v1532_v34  ;;  %v2664_v34 = vld [vmem:[%s3782_s7 + $0x38] sm:$0xf0] }
 0x26a   : > { %2617 = vmatmul.msk.bf16.vlgmr.msrb.gmra.mxu1 %vm1419_vm0, %v1627_v31  ;;  %2978 = vrcp.f32 %v3048_v59  ;;  %v2878_v31 = vld [vmem:[%s3782_s7 + $0x34] sm:$0xf] }
 0x26b   : > { %v2902_v59 = vld [vmem:[%s3784_s9 + $0x70] sm:$0xff] }
 0x26d   : > { %v1578_v33 = vpop.f32.mrf.mxu1 }
 0x26e   : > { %v2663_v33 = vor.u32 %v2879_v30, %v2662_v29 }
 0x26f   : > { %v2977_v40 = vpop.eup %2976 }
 0x270   : > { %v2979_v1 = vpop.eup %2978  ;;  %1911 = vmatpush.bf16.msra.mxu0 %v2663_v33 }
 0x271   : > { %v1595_v36 = vpop.f32.mrf.mxu2  ;;  %v1770_v2 = vmul.f32 128.0, %v2979_v1  ;;  %vm1774_vm3 = vweird.f32 %v2979_v1 }
 0x272   : > { %v1624_v38 = vmul.f32 %v2975_v35, %v1595_v36  ;;  %v2667_v35 = vor.u32 %v2878_v31, %v2664_v34  ;;  %v2654_v36 = vld [vmem:[%s3782_s7 + $0x20] sm:$0xf] }
 0x273   : > { %v1771_v3 = vsub.f32 1.0, %v1770_v2  ;;  %v2891_v2 = vld [vmem:[%s3784_s9 + $0x18] sm:$0xff] }
 0x274   : > { %v1628_v39 = vpack.c.bf16 %v1624_v38, %v1624_v38  ;;  %v2877_v38 = vld [vmem:[%s3782_s7 + $0x24] sm:$0xf0] }
 0x275   : > { %v1772_v4 = vmul.f32 %v2979_v1, %v1771_v3  ;;  %v2899_v3 = vld [vmem:[%s3784_s9 + $0x58] sm:$0xff] }
 0x276   : > { %2626 = vmatmul.msk.bf16.vlgmr.msrb.gmra.mxu2 %vm1419_vm0, %v1628_v39  ;;  %v2876_v39 = vld [vmem:[%s3782_s7 + $0x24] sm:$0xf] }
 0x277   : > { %v1773_v5 = vadd.f32 %v2979_v1, %v1772_v4 }
 0x279   : > { %v1597_v41 = vpop.f32.mrf.mxu2  ;;  %v1614_v42 = vpop.f32.mrf.mxu3  ;;  %v3582_v6 = vsel %vm1774_vm3, %v2979_v1, %v1773_v5 }
 0x27a   : > { %v1625_v43 = vmul.f32 %v2977_v40, %v1614_v42  ;;  %v2655_v40 = vor.u32 %v2877_v38, %v2654_v36  ;;  %v2656_v41 = vld [vmem:[%s3782_s7 + $0x28] sm:$0xf0]  ;;  %v2959_v36 = vld [vmem:[%s3785_s10] ss:$0 sm:$0xff] }
 0x27b   : > { %v2659_v42 = vor.u32 %v2876_v39, %v2656_v41 }
 0x27c   : > { %v1629_v44 = vpack.c.bf16 %v1625_v43, %v1625_v43  ;;  %1912 = vmatpush.bf16.msra.mxu0 %v2655_v40  ;;  %v2646_v43 = vld [vmem:[%s3782_s7 + $0x10] sm:$0xf] }
 0x27e   : > { %2635 = vmatmul.msk.bf16.vlgmr.msrb.gmra.mxu3 %vm1419_vm0, %v1629_v44  ;;  %v2875_v44 = vld [vmem:[%s3782_s7 + $0x14] sm:$0xf0] }
 0x281   : > { %v1616_v45 = vpop.f32.mrf.mxu3 }
 0x282   : > { %v2874_v45 = vld [vmem:[%s3782_s7 + $0x14] sm:$0xf] }
 0x2df   : > { %v1670_v46 = vpop.f32.mrf.mxu0 }
 0x2e7   : > { %v1672_v47 = vpop.f32.mrf.mxu0  ;;  %v1698_v48 = vpop.f32.mrf.mxu1 }
 0x2e8   : > { %v1758_v50 = vadd.f32 %v1698_v48, %v1670_v46  ;;  %v2647_v46 = vor.u32 %v2875_v44, %v2646_v43  ;;  %v2648_v47 = vld [vmem:[%s3782_s7 + $0x18] sm:$0xf0] }
 0x2e9   : > { %v2651_v48 = vor.u32 %v2874_v45, %v2648_v47 }
 0x2ea   : > { %1913 = vmatpush.bf16.msra.mxu0 %v2647_v46 }
 0x2ef   : > { %v1700_v49 = vpop.f32.mrf.mxu1 }
 0x2f0   : > { %v2638_v49 = vld [vmem:[%s3782_s7] sm:$0xf] }
 0x2f9   : > { %v1726_v37 = vpop.f32.mrf.mxu2 }
 0x2fa   : > { %v1759_v51 = vadd.f32 %v1758_v50, %v1726_v37  ;;  %v2873_v37 = vld [vmem:[%s3782_s7 + $0x4] sm:$0xf0]  ;;  %v2872_v50 = vld [vmem:[%s3782_s7 + $0x4] sm:$0xf] }
 0x301   : > { %v1728_v53 = vpop.f32.mrf.mxu2  ;;  %v1754_v54 = vpop.f32.mrf.mxu3 }
 0x302   : > { %v1760_v55 = vadd.f32 %v1759_v51, %v1754_v54  ;;  %v2639_v51 = vor.u32 %v2873_v37, %v2638_v49  ;;  %v2895_v54 = vld [vmem:[%s3784_s9 + $0x38] sm:$0xff] }
 0x303   : > { %2069 = vmatpush.bf16.msra.mxu2 %v2895_v54 }
 0x304   : > { %v1765_v56 = vadd.f32 %v2956_v52, %v1760_v55  ;;  %v2640_v52 = vld [vmem:[%s3782_s7 + $0x8] sm:$0xf0]  ;;  %1914 = vmatpush.bf16.msra.mxu0 %v2639_v51  ;;  %v2903_v55 = vld [vmem:[%s3784_s9 + $0x78] sm:$0xff] }
 0x305   : > { %v2643_v53 = vor.u32 %v2872_v50, %v2640_v52  ;;  %2082 = vmatpush.bf16.msra.mxu3 %v2903_v55 }
 0x306   : > { %v1766_v57 = vadd.f32 %v1765_v56, %v3268_v32  ;;  %v2696_v32 = vld [vmem:[%s3782_s7 + $0x78] sm:$0xf0] }
 0x307   : > { %v2699_v0 = vor.u32 %v2886_v62, %v2696_v32  ;;  %v2901_v62 = vld [vmem:[%s3784_s9 + $0x68] sm:$0xff]  ;;  %v2900_v32 = vld [vmem:[%s3784_s9 + $0x60] sm:$0xff] }
 0x308   : > { %1767 = vadd.xlane.f32.xlu2 %v1766_v57 }
 0x309   : > { %v1756_v58 = vpop.f32.mrf.mxu3  ;;  %1920 = vmatpush.bf16.msra.mxu1 %v2699_v0  ;;  %2083 = vmatpush.bf16.msra.mxu3 %v2902_v59  ;;  %v2961_v59 = vld [vmem:[%s3787_s12] ss:$0 sm:$0xff] }
 0x30a   : > { %v2894_v58 = vld [vmem:[%s3784_s9 + $0x30] sm:$0xff] }
 0x30b   : > { %2070 = vmatpush.bf16.msra.mxu2 %v2894_v58 }
 0x30d   : > { %1921 = vmatpush.bf16.msra.mxu1 %v2691_v16  ;;  %2084 = vmatpush.bf16.msra.mxu3 %v2901_v62 }
 0x30f   : > { %2071 = vmatpush.bf16.msra.mxu2 %v2893_v61 }
 0x311   : > { %1922 = vmatpush.bf16.msra.mxu1 %v2683_v22  ;;  %2085 = vmatpush.bf16.msra.mxu3 %v2900_v32  ;;  %v1821_v22 = vld [vmem:[%s3783_s8] sm:$0x3] }
 0x312   : > { %v1823_v23 = vperm.slane %v1821_v22, 0  ;;  %v1824_v24 = vperm.slane %v1821_v22, 1 }
 0x313   : > { %2072 = vmatpush.bf16.msra.mxu2 %v2892_v63 }
 0x315   : > { %1923 = vmatpush.bf16.msra.mxu1 %v2675_v28  ;;  %2086 = vmatpush.bf16.msra.mxu3 %v2899_v3 }
 0x317   : > { %2073 = vmatpush.bf16.msra.mxu2 %v2891_v2 }
 0x319   : > { %1924 = vmatpush.bf16.msra.mxu1 %v2667_v35 }
 0x31d   : > { %1925 = vmatpush.bf16.msra.mxu1 %v2659_v42 }
 0x321   : > { %1926 = vmatpush.bf16.msra.mxu1 %v2651_v48 }
 0x325   : > { %1927 = vmatpush.bf16.msra.mxu1 %v2643_v53 }
 0x37b   : > { %v1768_v7 = vpop.xlane.xlu2 %1767 }
 0x37c   : > { %v1776_v8 = vmul.f32 %v3582_v6, %v1768_v7  ;;  %v2890_v7 = vld [vmem:[%s3784_s9 + $0x10] sm:$0xff] }
 0x37d   : > { %2074 = vmatpush.bf16.msra.mxu2 %v2890_v7 }
 0x37e   : > { %v3585_v9 = vsub.f32 %v1766_v57, %v1776_v8  ;;  %v2898_v8 = vld [vmem:[%s3784_s9 + $0x50] sm:$0xff] }
 0x37f   : > { %2087 = vmatpush.bf16.msra.mxu3 %v2898_v8 }
 0x380   : > { %v1778_v10 = vmul.f32 %v3585_v9, %v3585_v9 }
 0x381   : > { %2075 = vmatpush.bf16.msra.mxu2 %v2889_v19 }
 0x382   : > { %1779 = vadd.xlane.f32.xlu0 %v1778_v10 }
 0x383   : > { %2088 = vmatpush.bf16.msra.mxu3 %v2897_v20 }
 0x387   : > { %2089 = vmatpush.bf16.msra.mxu3 %v2896_v21 }
 0x3f5   : > { %v1780_v56 = vpop.xlane.xlu0 %1779 }
 0x3f6   : > { %v1781_v57 = vmul.f32 %v1780_v56, %v3582_v6 }
 0x3f8   : > { %v1782_v60 = vadd.f32 1e-05, %v1781_v57  ;;  %v2960_v57 = vld [vmem:[%s3786_s11] ss:$0 sm:$0xff] }
 0x3fa   : > { %2980 = vrsqrt.f32 %v1782_v60  ;;  %vm1789_vm5 = vweird.f32 %v1782_v60 }
 0x400   : > { %v2981_v0 = vpop.eup %2980 }
 0x401   : > { %v1784_v1 = vmul.f32 %v2981_v0, %v1782_v60  ;;  %vm1790_vm4 = vweird.f32 %v2981_v0 }
 0x402   : > { %vm1791_vm6 = vmor %vm1789_vm5, %vm1790_vm4 }
 0x403   : > { %v1785_v4 = vmul.f32 %v2981_v0, %v1784_v1 }
 0x405   : > { %v1786_v5 = vmul.f32 0.5, %v1785_v4 }
 0x407   : > { %v1787_v10 = vsub.f32 1.5, %v1786_v5 }
 0x409   : > { %v1788_v11 = vmul.f32 %v2981_v0, %v1787_v10 }
 0x40b   : > { %v1792_v13 = vsel %vm1791_vm6, %v2981_v0, %v1788_v11 }
 0x40c   : > { %v1793_v14 = vmul.f32 %v1792_v13, %v3585_v9  ;;  %v2888_v9 = vld [vmem:[%s3784_s9] sm:$0xff] }
 0x40d   : > { %2076 = vmatpush.bf16.msra.mxu2 %v2888_v9 }
 0x40e   : > { %v1798_v16 = vmul.f32 %v2957_v12, %v1793_v14 }
 0x410   : > { %v1803_v17 = vadd.f32 %v2958_v15, %v1798_v16 }
 0x412   : > { %v1804_v18 = vpack.c.bf16 %v1803_v17, %v1803_v17 }
 0x414   : > { %1915 = vmatmul.bf16.vlgmr.msra.gmra.mxu0 %v1804_v18  ;;  %1928 = vmatmul.bf16.vlgmr.msra.gmra.mxu1 %v1804_v18 }
 0x491   : > { %v1916_v25 = vpop.f32.mrf.mxu0  ;;  %v1929_v26 = vpop.f32.mrf.mxu1 }
 0x492   : > { %v1917_v27 = vadd.f32 %v1916_v25, %v1823_v23  ;;  %v1930_v28 = vadd.f32 %v1929_v26, %v1824_v24 }
 0x494   : > { %v1933_v29 = vmax.f32 %v1917_v27, 0.0  ;;  %v1934_v30 = vmax.f32 %v1930_v28, 0.0 }
 0x496   : > { %v1935_v31 = vpack.c.bf16 %v1933_v29, %v1933_v29  ;;  %v1936_v33 = vpack.c.bf16 %v1934_v30, %v1934_v30 }
 0x498   : > { %2077 = vmatmul.bf16.vlgmr.msra.gmra.mxu2 %v1935_v31  ;;  %2090 = vmatmul.bf16.vlgmr.msra.gmra.mxu3 %v1936_v33 }
 0x499   : > { %v1918_v34 = vpop.f32.mrf.mxu0  ;;  %v1931_v35 = vpop.f32.mrf.mxu1 }
 0x51b   : > { %v2078_v38 = vpop.f32.mrf.mxu2  ;;  %v2091_v39 = vpop.f32.mrf.mxu3 }
 0x51c   : > { %v2079_v40 = vadd.f32 %v2959_v36, %v2078_v38 }
 0x51e   : > { %v2092_v41 = vadd.f32 %v2091_v39, %v2079_v40 }
 0x520   : > { %v2095_v42 = vadd.f32 %v2092_v41, %v1803_v17 }
 0x522   : > { %2096 = vadd.xlane.f32.xlu1 %v2095_v42 }
 0x523   : > { %v2080_v43 = vpop.f32.mrf.mxu2  ;;  %v2093_v44 = vpop.f32.mrf.mxu3 }
 0x595   : > { %v2097_v45 = vpop.xlane.xlu1 %2096 }
 0x596   : > { %v2098_v46 = vmul.f32 %v2097_v45, %v3582_v6 }
 0x598   : > { %v2099_v47 = vsub.f32 %v2095_v42, %v2098_v46 }
 0x59a   : > { %v2100_v48 = vmul.f32 %v2099_v47, %v2099_v47 }
 0x59c   : > { %2101 = vadd.xlane.f32.xlu2 %v2100_v48 }
 0x60f   : > { %v2102_v49 = vpop.xlane.xlu2 %2101 }
 0x610   : > { %v2103_v37 = vmul.f32 %v2102_v49, %v3582_v6 }
 0x612   : > { %v2104_v50 = vadd.f32 1e-05, %v2103_v37 }
 0x614   : > { %2982 = vrsqrt.f32 %v2104_v50  ;;  %vm2111_vm8 = vweird.f32 %v2104_v50 }
 0x61a   : > { %v2983_v51 = vpop.eup %2982 }
 0x61b   : > { %v2106_v52 = vmul.f32 %v2983_v51, %v2104_v50  ;;  %vm2112_vm7 = vweird.f32 %v2983_v51 }
 0x61c   : > { %vm2113_vm9 = vmor %vm2111_vm8, %vm2112_vm7 }
 0x61d   : > { %v2107_v53 = vmul.f32 %v2983_v51, %v2106_v52 }
 0x61f   : > { %v2108_v54 = vmul.f32 0.5, %v2107_v53 }
 0x621   : > { %v2109_v55 = vsub.f32 1.5, %v2108_v54 }
 0x623   : > { %v2110_v56 = vmul.f32 %v2983_v51, %v2109_v55 }
 0x625   : > { %v2114_v6 = vsel %vm2113_vm9, %v2983_v51, %v2110_v56 }
 0x626   : > { %v2115_v58 = vmul.f32 %v2114_v6, %v2099_v47 }
 0x628   : > { %v2120_v60 = vmul.f32 %v2960_v57, %v2115_v58 }
 0x62a   : > { %v2125_v61 = vadd.f32 %v2961_v59, %v2120_v60 }
 0x62c   : > { %2126 = vst [vmem:[%s431_s20] sm:$0xff] %v2125_v61 }
 0x62d   : > { %3011 = shalt.err (!%p3008_p3)
}
 0x62e   : > { %2904 = dma.vmem_to_hbm [thread:$0]  (%p3157_p5), %s2141_s29, 128, %s2143_s30, %s2128_s23  }
 0x62f PF: > { %p2910_p4 = scmp.ge.s32.totalorder %s3046_s28, 2  ;;  %s2154_s24 = sand.u32 1, %s3034_s25  }
 0x630   : > { %s2155_s20 = scalar_lea.sflag [#allocation3], %s2154_s24 }
 0x631   : > { %p2907_p7 = pnand %p2910_p4, %p3161_p6 }
 0x633   : > { %p2908_p8 = pneg %p2907_p7 }
 0x635   : > { %3029 = dma.done.wait (%p2908_p8), %s2155_s20, 128  }
 0x636   : > { %3031 = vsyncadd (%p2908_p8), %s2155_s20, 4294967168  ;;  %s3800_s28 = sld [smem:[#allocation6_spill]]  ;;  %s3803_s25 = smov %s3038_s26 }
 0x637   : > { %s3801_s17 = sld [smem:[#allocation5_spill]] }
 0x638   : > { %s3802_s27 = sld [smem:[#allocation7_spill]] }
 0x63c   : > { %p23_p9 = scmp.ge.s32.totalorder %s3800_s28, 4  }
 0x63d   : > { %s3804_s26 = smov %s3801_s17 }
 0x63e   :  { %25 = sbr.rel (!%p23_p9) target bundleno = 3 (0x3), region = 107 }
 0x643   :  { %2161 = vsyncpa [#allocation3], 1 }
 0x644   :  { %2163 = vsyncpa [#allocation3 + $0x1], 1 }

</bundles_post_ra>
